<compile_context>
chip_gen: v7x
topology: tpu7x:2x2x1
jax: 0.10.0
libtpu: 0.0.40
codegen_flags: <defaults>
</compile_context>

<pallas_src>
import functools

import jax
import jax.numpy as jnp
from jax.experimental import pallas as pl
from jax.experimental.pallas import tpu as pltpu


def _round_up(x: int, m: int) -> int:
    return ((x + m - 1) // m) * m


def _cln_kernel(x_ref, gain_ref, bias_ref, out_ref, *, eps: float):
    """One (batch, L-tile) block: x (N, tL), gain/bias (N, 1) -> out (N, tL)."""
    x = x_ref[...].astype(jnp.float32)                      # (N, tL)
    n = x.shape[0]
    inv_n = 1.0 / n
    mean = jnp.sum(x, axis=0, keepdims=True) * inv_n        # (1, tL)
    xc = x - mean
    var = jnp.sum(xc * xc, axis=0, keepdims=True) * inv_n   # biased variance
    inv_std = jax.lax.rsqrt(var + eps)                      # (1, tL), EUP
    g = gain_ref[...].astype(jnp.float32)                   # (N, 1)
    b = bias_ref[...].astype(jnp.float32)                   # (N, 1)
    out_ref[...] = (g * (xc * inv_std) + b).astype(out_ref.dtype)


@functools.partial(jax.jit, static_argnames=("eps", "block_l"))
def cumulative_layer_norm(x, gain, bias, *, eps: float = 1e-8, block_l: int = 2048):
    """cLN forward.

    Args:
      x:    (B, N, L)
      gain: (1, N, 1)  (gamma)
      bias: (1, N, 1)  (beta)
    Returns:
      (B, N, L), same dtype as x.
    """
    B, N, L = x.shape
    LANE = 128

    # Lane tile: multiple of 128, capped so double-buffered f32 blocks stay
    # small on v7x's 64 MiB VMEM while still amortizing per-step overhead.
    tl = min(block_l, _round_up(L, LANE))
    l_pad = _round_up(L, tl)
    num_l_tiles = l_pad // tl

    if l_pad != L:
        # Padded columns are independent and sliced off afterwards
        # (var=0 -> rsqrt(eps) is finite, no NaNs).
        x = jnp.pad(x, ((0, 0), (0, 0), (0, l_pad - L)))

    gain2 = jnp.reshape(gain, (N, 1))
    bias2 = jnp.reshape(bias, (N, 1))

    cost = pl.CostEstimate(
        flops=8 * B * N * l_pad,
        transcendentals=B * l_pad,
        bytes_accessed=(2 * B * N * l_pad + 2 * N) * x.dtype.itemsize,
    )

    out = pl.pallas_call(
        functools.partial(_cln_kernel, eps=eps),
        out_shape=jax.ShapeDtypeStruct((B, N, l_pad), x.dtype),
        grid=(B, num_l_tiles),
        in_specs=[
            # One batch element, full channel extent, one L tile per step.
            pl.BlockSpec((None, N, tl), lambda b, l: (b, 0, l)),
            # gain / bias are shared across the whole grid.
            pl.BlockSpec((N, 1), lambda b, l: (0, 0)),
            pl.BlockSpec((N, 1), lambda b, l: (0, 0)),
        ],
        out_specs=pl.BlockSpec((None, N, tl), lambda b, l: (b, 0, l)),
        compiler_params=pltpu.CompilerParams(
            dimension_semantics=("parallel", "parallel"),
        ),
        cost_estimate=cost,
    )(x, gain2, bias2)

    if l_pad != L:
        out = out[:, :, :L]
    return out


def reference_forward(x, gain, bias, *, eps: float = 1e-8):
    """Pure-JAX mirror of the PyTorch forward for correctness checking."""
    mean = jnp.mean(x, axis=1, keepdims=True)
    var = jnp.mean(jnp.square(x - mean), axis=1, keepdims=True)  # unbiased=False
    return gain * (x - mean) / jnp.sqrt(var + eps) + bias


if __name__ == "__main__":
    # Small shapes consistent with the module: (B, dimension, L).
    B = 2
    dimension = 32     # N (channel / "layer size")
    L = 200            # time frames; exercises the lane-padding path (-> 256)
    eps = 1e-8

    key = jax.random.PRNGKey(0)
    k_x, k_g, k_b = jax.random.split(key, 3)

    x = jax.random.normal(k_x, (B, dimension, L), dtype=jnp.float32)
    # Random (not identity) gain/bias so the affine path is actually tested.
    gain = 1.0 + 0.1 * jax.random.normal(k_g, (1, dimension, 1), dtype=jnp.float32)
    bias = 0.1 * jax.random.normal(k_b, (1, dimension, 1), dtype=jnp.float32)

    out = cumulative_layer_norm(x, gain, bias, eps=eps)
    out = jax.block_until_ready(out)

    ref = jax.block_until_ready(reference_forward(x, gain, bias, eps=eps))

    assert out.shape == (B, dimension, L), out.shape
    max_err = float(jnp.max(jnp.abs(out - ref)))
    assert jnp.allclose(out, ref, atol=1e-4, rtol=1e-4), max_err
    print("KERNEL_OK")
</pallas_src>

<mosaic_0001>
module attributes {stable_mosaic.version = 11 : i64} {
  func.func @_cln_kernel(%arg0: i32, %arg1: i32, %arg2: memref<1x32x256xf32, #tpu.memory_space<vmem>>, %arg3: memref<32x1xf32, #tpu.memory_space<vmem>>, %arg4: memref<32x1xf32, #tpu.memory_space<vmem>>, %arg5: memref<1x32x256xf32, #tpu.memory_space<vmem>>) attributes {dimension_semantics = [#tpu.dimension_semantics<parallel>, #tpu.dimension_semantics<parallel>], iteration_bounds = array<i64: 2, 1>, scalar_prefetch = 0 : i64, scratch_operands = 0 : i64, tpu.core_type = #tpu.core_type<tc>, window_params = [{transform_indices = @transform_0, window_bounds = array<i64: 1, 32, 256>}, {pipeline_mode = #tpu.pipeline_mode<synchronous>, transform_indices = @transform_1, window_bounds = array<i64: 32, 1>}, {pipeline_mode = #tpu.pipeline_mode<synchronous>, transform_indices = @transform_2, window_bounds = array<i64: 32, 1>}, {transform_indices = @transform_3, window_bounds = array<i64: 1, 32, 256>}]} {
    %c0 = arith.constant 0 : index
    %c0_0 = arith.constant 0 : index
    %c0_1 = arith.constant 0 : index
    %0 = vector.load %arg2[%c0, %c0_0, %c0_1] : memref<1x32x256xf32, #tpu.memory_space<vmem>>, vector<1x32x256xf32>
    %1 = vector.shape_cast %0 : vector<1x32x256xf32> to vector<32x256xf32>
    %cst = arith.constant dense<0.000000e+00> : vector<256xf32>
    %2 = vector.multi_reduction <add>, %1, %cst [0] : vector<32x256xf32> to vector<256xf32>
    %3 = vector.shape_cast %2 : vector<256xf32> to vector<1x256xf32>
    %cst_2 = arith.constant 3.125000e-02 : f32
    %4 = vector.broadcast %cst_2 : f32 to vector<1x256xf32>
    %5 = arith.mulf %3, %4 : vector<1x256xf32>
    %6 = vector.broadcast %5 : vector<1x256xf32> to vector<32x256xf32>
    %7 = arith.subf %1, %6 : vector<32x256xf32>
    %8 = arith.mulf %7, %7 : vector<32x256xf32>
    %cst_3 = arith.constant dense<0.000000e+00> : vector<256xf32>
    %9 = vector.multi_reduction <add>, %8, %cst_3 [0] : vector<32x256xf32> to vector<256xf32>
    %10 = vector.shape_cast %9 : vector<256xf32> to vector<1x256xf32>
    %cst_4 = arith.constant 3.125000e-02 : f32
    %11 = vector.broadcast %cst_4 : f32 to vector<1x256xf32>
    %12 = arith.mulf %10, %11 : vector<1x256xf32>
    %cst_5 = arith.constant 9.99999993E-9 : f32
    %13 = vector.broadcast %cst_5 : f32 to vector<1x256xf32>
    %14 = arith.addf %12, %13 : vector<1x256xf32>
    %15 = math.rsqrt %14 : vector<1x256xf32>
    %c0_6 = arith.constant 0 : index
    %c0_7 = arith.constant 0 : index
    %16 = vector.load %arg3[%c0_6, %c0_7] : memref<32x1xf32, #tpu.memory_space<vmem>>, vector<32x1xf32>
    %c0_8 = arith.constant 0 : index
    %c0_9 = arith.constant 0 : index
    %17 = vector.load %arg4[%c0_8, %c0_9] : memref<32x1xf32, #tpu.memory_space<vmem>>, vector<32x1xf32>
    %18 = vector.broadcast %15 : vector<1x256xf32> to vector<32x256xf32>
    %19 = arith.mulf %7, %18 : vector<32x256xf32>
    %20 = vector.broadcast %16 : vector<32x1xf32> to vector<32x256xf32>
    %21 = arith.mulf %20, %19 : vector<32x256xf32>
    %22 = vector.broadcast %17 : vector<32x1xf32> to vector<32x256xf32>
    %23 = arith.addf %21, %22 : vector<32x256xf32>
    %c0_10 = arith.constant 0 : index
    %c0_11 = arith.constant 0 : index
    %c0_12 = arith.constant 0 : index
    %24 = vector.load %arg5[%c0_10, %c0_11, %c0_12] : memref<1x32x256xf32, #tpu.memory_space<vmem>>, vector<1x32x256xf32>
    %25 = vector.shape_cast %24 : vector<1x32x256xf32> to vector<32x256xf32>
    %26 = vector.shape_cast %23 : vector<32x256xf32> to vector<1x32x256xf32>
    tpu.vector_store %arg5[%c0_10, %c0_11, %c0_12], %26 {strides = array<i32>} : memref<1x32x256xf32, #tpu.memory_space<vmem>>, vector<1x32x256xf32>,
    return
  }
  func.func @transform_0(%arg0: i32, %arg1: i32) -> (i32, i32, i32) {
    %c0_i32 = arith.constant 0 : i32
    %c0_i32_0 = arith.constant 0 : i32
    return %arg0, %c0_i32, %arg1 : i32, i32, i32
  }
  func.func @transform_1(%arg0: i32, %arg1: i32) -> (i32, i32) {
    %c0_i32 = arith.constant 0 : i32
    %c0_i32_0 = arith.constant 0 : i32
    %c0_i32_1 = arith.constant 0 : i32
    return %c0_i32, %c0_i32_0 : i32, i32
  }
  func.func @transform_2(%arg0: i32, %arg1: i32) -> (i32, i32) {
    %c0_i32 = arith.constant 0 : i32
    %c0_i32_0 = arith.constant 0 : i32
    %c0_i32_1 = arith.constant 0 : i32
    return %c0_i32, %c0_i32_0 : i32, i32
  }
  func.func @transform_3(%arg0: i32, %arg1: i32) -> (i32, i32, i32) {
    %c0_i32 = arith.constant 0 : i32
    %c0_i32_0 = arith.constant 0 : i32
    return %arg0, %c0_i32, %arg1 : i32, i32, i32
  }
}

</mosaic_0001>

<bundles_post_ra>
// kernel: cumulative_layer_norm.1
= control target key start
LH: loop header
LB: loop body
LE: loop exit
PB: predicated region body
PF: predicated region fallthrough
CT: control target
= control target key end

     0   :  { %8 = vsyncpa [#allocation3], 0  ;;  %s769_s0 = inlined_call_operand.vmem [shape: f32[2,32,256], index: 0, kind: input, shape index: {}]   ;;  %s770_s1 = inlined_call_operand.vmem [shape: f32[32,1], index: 1, kind: input, shape index: {}]   ;;  %s771_s2 = inlined_call_operand.vmem [shape: f32[32,1], index: 2, kind: input, shape index: {}]   ;;  %s772_s3 = inlined_call_operand.hbm [shape: f32[2,32,256], index: 3, kind: output, shape index: {}]  }
   0x1   :  { %10 = vsyncpa [#allocation3 + $0x1], 0  ;;  %s626_s12 = smov 0   ;;  %s628_s13 = smov 0  }
   0x2   :  { %s630_s14 = smov 0   ;;  %s632_s15 = smov 0  }
   0x3   :  { %s634_s16 = smov 0   ;;  %s636_s17 = smov 0  }
   0x4 LB: > { %s443_s18 = sadd.s32 4294967295, %s600_s17   ;;  %s444_s19 = sadd.s32 4294967294, %s600_s17   ;;  %s600_s17 = sphi %s636_s17, %s16_s17   ;;  %s596_s16 = sphi %s634_s16, %s779_s16   ;;  %s592_s15 = sphi %s632_s15, %s778_s15   ;;  %s588_s14 = sphi %s630_s14, %s777_s14   ;;  %s584_s13 = sphi %s628_s13, %s776_s13   ;;  %s580_s12 = sphi %s626_s12, %s775_s12  }
   0x5   : > { %s28_s20 = sadd.s32 1, %s596_s16  ;;  %s107_s21 = sadd.s32 1, %s588_s14 }
   0x6   : > { %p30_p0 = scmp.ge.s32.totalorder %s28_s20, 2  ;;  %p117_p1 = scmp.ne.s32.totalorder %s588_s14, %s584_s13 }
   0x7   : > { %p118_p2 = scmp.eq.s32.totalorder %s443_s18, 1  ;;  %p123_p3 = scmp.ne.s32.totalorder %s584_s13, %s580_s12 }
   0x8   : > { %s781_s20 = smov (%p30_p0, %s28_s20), 0  ;;  %p124_p5 = scmp.eq.s32.totalorder %s444_s19, 1 }
   0x9   : > { %p666_p4 = por %p118_p2, %p117_p1  ;;  %s102_s23 = ssub.s32 %s596_s16, %s781_s20 }
   0xa   : > { %p447_p6 = scmp.ge.s32.totalorder %s600_s17, 1  ;;  %p105_p7 = scmp.eq.s32.totalorder %s102_s23, 0 }
   0xb   : > { %p673_p8 = por %p124_p5, %p123_p3  ;;  %p161_p9 = scmp.lt.s32.totalorder %s600_s17, 3 }
   0xc   : > { %s679_s25 = scalar_select %p105_p7, %s588_s14, %s107_s21  }
   0xd   : > { %p162_p10 = pnand %p447_p6, %p161_p9 }
   0xe   : > { %v270_v0 = vld [vmem:[%s770_s1 + $0x10] sm:$0xff] (!%p162_p10)  ;;  %v268_v1 = vld [vmem:[%s770_s1] sm:$0xff] (!%p162_p10)  ;;  %v602_v2 = vmov (!%p162_p10), 0   ;;  %v271_v3 = vld [vmem:[%s770_s1 + $0x18] sm:$0xff] (!%p162_p10)  ;;  %p190_p11 = scmp.lt.s32.totalorder (!%p162_p10), %s592_s15, 1  ;;  %s186_s30 = sand.u32 (!%p162_p10), 1, %s584_s13  }
   0xf   : > { %165 = sbr.rel (%p162_p10) target bundleno = 174 (0xae), region = 32  ;;  %517 = vset.pattern.permute.xlu1 (!%p162_p10), %v602_v2  ;;  %516 = vset.pattern.permute.xlu0 (!%p162_p10), %v602_v2  ;;  %v269_v4 = vld [vmem:[%s770_s1 + $0x8] sm:$0xff] (!%p162_p10)  ;;  %v272_v6 = vld [vmem:[%s771_s2] sm:$0xff] (!%p162_p10)  ;;  %v275_v7 = vld [vmem:[%s771_s2 + $0x18] sm:$0xff] (!%p162_p10)  ;;  %s448_s4 = sshll.u32 (!%p162_p10), %s186_s30, 6 }
  0x10   : > { %296 = vperm.xlu1 (!%p162_p10), %517, %v270_v0   ;;  %286 = vperm.xlu0 (!%p162_p10), %516, %v268_v1   ;;  %v273_v5 = vld [vmem:[%s771_s2 + $0x8] sm:$0xff] (!%p162_p10)  ;;  %v274_v8 = vld [vmem:[%s771_s2 + $0x10] sm:$0xff] (!%p162_p10)  ;;  %s457_s5 = sshll.u32 (!%p162_p10), %s592_s15, 10  ;;  %s188_s6 = scalar_lea.vmem (!%p162_p10), [#allocation2], %s448_s4 }
  0x11   : > { %s364_s7 = sshll.u32 (!%p162_p10), %s188_s6, 4  ;;  %s717_s10 = scalar_lea.hbm (!%p162_p10), %s772_s3, %s457_s5  ;;  %s719_s7 = int_to_ptr.vmem [resolvable:$true] %s364_s7 }
  0x12   : > { %s522_s11 = scalar_lea.vmem (!%p162_p10), %s719_s7, 1024  ;;  %s603_s18 = smov (!%p162_p10), [#allocation2]  }
  0x13   : > { %p523_p12 = scmp.ne.s32.totalorder (!%p162_p10), %s719_s7, %s522_s11  ;;  %s526_s19 = sshll.u32 (!%p162_p10), %s603_s18, 4  ;;  %s527_s19 = int_to_ptr.vmem [resolvable:$false] %s526_s19 }
  0x14   : > { %301 = vperm.xlu1 (!%p162_p10), %517, %v271_v3   ;;  %291 = vperm.xlu0 (!%p162_p10), %516, %v269_v4   ;;  %s528_s21 = scalar_lea.vmem (!%p162_p10), %s527_s19, 2048  ;;  %p529_p1 = scmp.lt.s32.totalorder (!%p162_p10), %s719_s7, %s527_s19 }
  0x15   : > { %p524_p13 = pnand (!%p162_p10), %p523_p12, %p666_p4  ;;  %p530_p2 = scmp.lt.s32.totalorder (!%p162_p10), %s528_s21, %s522_s11 }
  0x16   : > { %s191_s23 = scalar_select %p190_p11, %s592_s15, 1 }
  0x17   : > { %s723_s15 = scalar_lea.sflag [#allocation3], %s186_s30  ;;  %p525_p0 = pneg %p524_p13 }
  0x18   : > { %319 = vperm.xlu1 %517, %v273_v5   ;;  %314 = vperm.xlu0 %516, %v272_v6   ;;  %s456_s26 = sshll.u32 %s191_s23, 6  ;;  %p531_p3 = por %p530_p2, %p529_p1 }
  0x19   : > { %s197_s29 = scalar_lea.vmem %s769_s0, %s456_s26 }
  0x1a   : > { %v200_v9 = vld [vmem:[%s197_s29] sm:$0xff]  ;;  %v202_v10 = vld [vmem:[%s197_s29 + $0x10] sm:$0xff]  ;;  %v201_v11 = vld [vmem:[%s197_s29 + $0x8] sm:$0xff]  ;;  %p532_p5 = pnand %p531_p3, %p525_p0 }
  0x1b   : > { %v203_v12 = vld [vmem:[%s197_s29 + $0x18] sm:$0xff]  ;;  %v208_v13 = vadd.f32 %v202_v10, %v200_v9  ;;  %v204_v14 = vld [vmem:[%s197_s29 + $0x20] sm:$0xff]  ;;  %v205_v16 = vld [vmem:[%s197_s29 + $0x28] sm:$0xff] }
  0x1c   : > { %329 = vperm.xlu1 %517, %v275_v7   ;;  %324 = vperm.xlu0 %516, %v274_v8   ;;  %v217_v15 = vadd.f32 %v203_v12, %v201_v11  ;;  %v206_v18 = vld [vmem:[%s197_s29 + $0x30] sm:$0xff]  ;;  %v207_v20 = vld [vmem:[%s197_s29 + $0x38] sm:$0xff] }
  0x1d   : > { %v209_v17 = vadd.f32 %v208_v13, %v204_v14 }
  0x1e   : > { %v218_v19 = vadd.f32 %v217_v15, %v205_v16 }
  0x1f   : > { %v210_v21 = vadd.f32 %v209_v17, %v206_v18 }
  0x20   : > { %v219_v22 = vadd.f32 %v218_v19, %v207_v20 }
  0x21   : > { %v211_v23 = vrot.slane %v210_v21, 4 }
  0x22   : > { %v220_v24 = vrot.slane %v219_v22, 4 }
  0x23   : > { %v212_v25 = vadd.f32 %v211_v23, %v210_v21 }
  0x24   : > { %v221_v26 = vadd.f32 %v220_v24, %v219_v22 }
  0x25   : > { %v213_v27 = vrot.slane %v212_v25, 2 }
  0x26   : > { %v222_v28 = vrot.slane %v221_v26, 2 }
  0x27   : > { %v214_v29 = vadd.f32 %v213_v27, %v212_v25 }
  0x28   : > { %v223_v30 = vadd.f32 %v222_v28, %v221_v26 }
  0x29   : > { %v215_v31 = vrot.slane %v214_v29, 1 }
  0x2a   : > { %v224_v32 = vrot.slane %v223_v30, 1 }
  0x2b   : > { %v216_v33 = vadd.f32 %v215_v31, %v214_v29 }
  0x2c   : > { %v225_v34 = vadd.f32 %v224_v32, %v223_v30 }
  0x2d   : > { %v226_v35 = vmul.f32 0.03125, %v216_v33 }
  0x2e   : > { %v227_v36 = vmul.f32 0.03125, %v225_v34 }
  0x2f   : > { %v228_v37 = vsub.f32 %v200_v9, %v226_v35  ;;  %v230_v38 = vsub.f32 %v202_v10, %v226_v35  ;;  %v232_v41 = vsub.f32 %v204_v14, %v226_v35  ;;  %v234_v47 = vsub.f32 %v206_v18, %v226_v35 }
  0x30   : > { %v229_v39 = vsub.f32 %v201_v11, %v227_v36  ;;  %v231_v40 = vsub.f32 %v203_v12, %v227_v36  ;;  %v233_v44 = vsub.f32 %v205_v16, %v227_v36  ;;  %v235_v50 = vsub.f32 %v207_v20, %v227_v36 }
  0x31   : > { %v236_v42 = vmul.f32 %v228_v37, %v228_v37  ;;  %v238_v43 = vmul.f32 %v230_v38, %v230_v38  ;;  %v240_v48 = vmul.f32 %v232_v41, %v232_v41  ;;  %v242_v53 = vmul.f32 %v234_v47, %v234_v47 }
  0x32   : > { %v237_v45 = vmul.f32 %v229_v39, %v229_v39  ;;  %v239_v46 = vmul.f32 %v231_v40, %v231_v40  ;;  %v241_v51 = vmul.f32 %v233_v44, %v233_v44  ;;  %v243_v55 = vmul.f32 %v235_v50, %v235_v50 }
  0x33   : > { %v244_v49 = vadd.f32 %v238_v43, %v236_v42 }
  0x34   : > { %v253_v52 = vadd.f32 %v239_v46, %v237_v45 }
  0x35   : > { %v245_v54 = vadd.f32 %v244_v49, %v240_v48 }
  0x36   : > { %v254_v56 = vadd.f32 %v253_v52, %v241_v51 }
  0x37   : > { %v246_v57 = vadd.f32 %v245_v54, %v242_v53 }
  0x38   : > { %v255_v58 = vadd.f32 %v254_v56, %v243_v55 }
  0x39   : > { %v247_v59 = vrot.slane %v246_v57, 4 }
  0x3a   : > { %v256_v60 = vrot.slane %v255_v58, 4 }
  0x3b   : > { %v248_v61 = vadd.f32 %v247_v59, %v246_v57 }
  0x3c   : > { %v257_v62 = vadd.f32 %v256_v60, %v255_v58 }
  0x3d   : > { %v249_v63 = vrot.slane %v248_v61, 2 }
  0x3e   : > { %v258_v0 = vrot.slane %v257_v62, 2 }
  0x3f   : > { %v250_v1 = vadd.f32 %v249_v63, %v248_v61 }
  0x40   : > { %v259_v2 = vadd.f32 %v258_v0, %v257_v62 }
  0x41   : > { %v251_v3 = vrot.slane %v250_v1, 1 }
  0x42   : > { %v260_v4 = vrot.slane %v259_v2, 1 }
  0x43   : > { %v252_v5 = vadd.f32 %v251_v3, %v250_v1 }
  0x44   : > { %v261_v6 = vadd.f32 %v260_v4, %v259_v2 }
  0x45   : > { %v262_v7 = vmul.f32 0.03125, %v252_v5 }
  0x46   : > { %v263_v8 = vmul.f32 0.03125, %v261_v6 }
  0x47   : > { %v264_v9 = vadd.f32 1e-08, %v262_v7 }
  0x48   : > { %v265_v10 = vadd.f32 1e-08, %v263_v8 }
  0x49   : > { %518 = vrsqrt.f32 %v264_v9 }
  0x4a   : > { %520 = vrsqrt.f32 %v265_v10 }
  0x53   : > { %v519_v11 = vpop.eup %518 }
  0x54   : > { %v521_v12 = vpop.eup %520  ;;  %v276_v15 = vmul.f32 %v519_v11, %v228_v37  ;;  %v278_v17 = vmul.f32 %v519_v11, %v230_v38  ;;  %v280_v21 = vmul.f32 %v519_v11, %v232_v41  ;;  %v282_v23 = vmul.f32 %v519_v11, %v234_v47 }
  0x55   : > { %v277_v16 = vmul.f32 %v521_v12, %v229_v39  ;;  %v279_v18 = vmul.f32 %v521_v12, %v231_v40  ;;  %v281_v22 = vmul.f32 %v521_v12, %v233_v44  ;;  %v283_v24 = vmul.f32 %v521_v12, %v235_v50 }
  0x8f   : > { %v297_v13 = vpop.permute.xlu1 %296  ;;  %v287_v14 = vpop.permute.xlu0 %286 }
  0x90   : > { %v304_v25 = vmul.f32 %v287_v14, %v276_v15  ;;  %v305_v26 = vmul.f32 %v287_v14, %v277_v16  ;;  %v308_v35 = vmul.f32 %v297_v13, %v280_v21  ;;  %v309_v36 = vmul.f32 %v297_v13, %v281_v22 }
  0x93   : > { %v302_v19 = vpop.permute.xlu1 %301  ;;  %v292_v20 = vpop.permute.xlu0 %291 }
  0x94   : > { %v306_v27 = vmul.f32 %v292_v20, %v278_v17  ;;  %v307_v28 = vmul.f32 %v292_v20, %v279_v18  ;;  %v310_v37 = vmul.f32 %v302_v19, %v282_v23  ;;  %v311_v38 = vmul.f32 %v302_v19, %v283_v24 }
  0x97   : > { %v320_v29 = vpop.permute.xlu1 %319  ;;  %v315_v30 = vpop.permute.xlu0 %314 }
  0x98   : > { %v334_v31 = vadd.f32 %v320_v29, %v306_v27  ;;  %v335_v32 = vadd.f32 %v320_v29, %v307_v28  ;;  %v332_v33 = vadd.f32 %v315_v30, %v304_v25  ;;  %v333_v34 = vadd.f32 %v315_v30, %v305_v26 }
  0x9a   : > { %342 = vst [vmem:[%s188_s6 + $0x10] sm:$0xff] %v334_v31  ;;  %343 = vst [vmem:[%s188_s6 + $0x18] sm:$0xff] %v335_v32 }
  0x9b   : > { %340 = vst [vmem:[%s188_s6] sm:$0xff] %v332_v33  ;;  %341 = vst [vmem:[%s188_s6 + $0x8] sm:$0xff] %v333_v34  ;;  %v330_v39 = vpop.permute.xlu1 %329  ;;  %v325_v40 = vpop.permute.xlu0 %324 }
  0x9c   : > { %v338_v41 = vadd.f32 %v330_v39, %v310_v37  ;;  %v339_v42 = vadd.f32 %v330_v39, %v311_v38  ;;  %v336_v43 = vadd.f32 %v325_v40, %v308_v35  ;;  %v337_v44 = vadd.f32 %v325_v40, %v309_v36 }
  0x9e   : > { %346 = vst [vmem:[%s188_s6 + $0x30] sm:$0xff] %v338_v41  ;;  %347 = vst [vmem:[%s188_s6 + $0x38] sm:$0xff] %v339_v42 }
  0x9f   : > { %344 = vst [vmem:[%s188_s6 + $0x20] sm:$0xff] %v336_v43  ;;  %345 = vst [vmem:[%s188_s6 + $0x28] sm:$0xff] %v337_v44 }
  0xa0   : > { %535 = shalt.err (!%p532_p5)
}
  0xa1   : > { %s536_s23 = scalar_lea.hbm %s717_s10, 1024  ;;  %s540_s28 = scalar_lea.hbm %s772_s3, 2048 }
  0xa2   : > { %p537_p6 = scmp.ne.s32.totalorder %s717_s10, %s536_s23  ;;  %p541_p10 = scmp.lt.u32.totalorder %s717_s10, %s772_s3 }
  0xa3   : > { %p542_p11 = scmp.lt.u32.totalorder %s540_s28, %s536_s23  ;;  %p544_p13 = scmp.lt.u32.totalorder %s536_s23, %s717_s10 }
  0xa4   : > { %p538_p7 = pnand %p537_p6, %p666_p4 }
  0xa5   : > { %p543_p12 = por %p542_p11, %p541_p10 }
  0xa6   : > { %p539_p9 = pneg %p538_p7 }
  0xa7   : > { %p545_p0 = por %p544_p13, %p543_p12 }
  0xa9   : > { %p546_p1 = pnand %p545_p0, %p539_p9 }
  0xab   : > { %549 = shalt.err (!%p546_p1)
}
  0xac   : > { %s604_s4 = smov 256   ;;  %s605_s5 = smov 16  }
  0xad   : > { %458 = dma.vmem_to_hbm [thread:$0]  (%p666_p4), %s719_s7, 1024, %s717_s10, %s723_s15, %s604_s4, %s604_s4, %s605_s5  }
  0xae PF: > { %p464_p2 = scmp.ge.s32.totalorder %s600_s17, 2  ;;  %s379_s6 = sand.u32 1, %s580_s12  }
  0xaf   : > { %s380_s8 = scalar_lea.sflag [#allocation3], %s379_s6 }
  0xb0   : > { %p461_p3 = pnand %p464_p2, %p673_p8 }
  0xb2   : > { %575 = dma.done.wait (!%p461_p3), %s380_s8, 1024  }
  0xb3   : > { %577 = vsyncadd (!%p461_p3), %s380_s8, 4294966272  ;;  %s16_s17 = sadd.s32 1, %s600_s17   ;;  %s775_s12 = smov %s584_s13 }
  0xb4   : > { %p13_p5 = scmp.ge.s32.totalorder %s16_s17, 4   ;;  %s776_s13 = smov %s588_s14 }
  0xb5   : > { %s777_s14 = smov %s679_s25  ;;  %s778_s15 = smov %s596_s16 }
  0xb6   : > { %s779_s16 = smov %s781_s20  ;;  %15 = sbr.rel (!%p13_p5) target bundleno = 4 (0x4), region = 67 }
  0xbd   :  { %385 = vsyncpa [#allocation3], 1 }
  0xbe   :  { %387 = vsyncpa [#allocation3 + $0x1], 1 }

</bundles_post_ra>
